<compile_context>
chip_gen: v6e
topology: v6e:2x2x1
jax: 0.10.0
libtpu: 0.0.40
codegen_flags: <defaults>
</compile_context>

<pallas_src>
import math
import functools

import jax
import jax.numpy as jnp
from jax import lax
from jax.experimental import pallas as pl
from jax.experimental.pallas import tpu as pltpu


# ---------------------------------------------------------------- helpers ---

def _gelu(x):
    # exact (erf-based) GELU, matching torch.nn.GELU() default
    return 0.5 * x * (1.0 + lax.erf(x * 0.7071067811865476))


def _layernorm(x, w, b, eps=1e-6):
    mu = jnp.mean(x, axis=-1, keepdims=True)
    var = jnp.mean((x - mu) ** 2, axis=-1, keepdims=True)
    return (x - mu) * lax.rsqrt(var + eps) * w + b


def _vmem_limit_bytes():
    # Raise the scoped VMEM limit with headroom (defaults are far below
    # physical).  Capped at 64 MiB so the value stays legal on every
    # generation (v7x physical VMEM is 64 MiB / TensorCore).
    try:
        cap = pltpu.get_tpu_info().vmem_capacity_bytes
        return min(int(cap * 0.75), 64 * 1024 * 1024)
    except Exception:
        return None


# ---------------------------------------------------------------- kernels ---

def stem_kernel(p_ref, w_ref, b_ref, o_ref):
    # p_ref: (rt, C*p*p), w_ref: (C*p*p, D), b_ref: (1, D)  == Conv2d(stride=p)
    o_ref[...] = (
        jnp.dot(p_ref[...], w_ref[...], preferred_element_type=jnp.float32)
        + b_ref[...]
    )


def mixer_blocks_kernel(
    x_ref,                                   # (Bt, N, D) patch embedding
    n1w_ref, n1b_ref,
    tfc1_ref, tb1_ref, tfc2_ref, tb2_ref,
    n2w_ref, n2b_ref,
    cfc1_ref, cb1_ref, cfc2_ref, cb2_ref,
    o_ref,                                   # (Bt, N, D) resident activation
    *, head,
):
    l = pl.program_id(1)                     # mixer-block index

    # At the first block, load the embedding into the resident activation
    # tile; it stays in VMEM across all blocks of this batch tile.
    @pl.when(l == 0)
    def _():
        o_ref[...] = x_ref[...]

    Bt, N, D = o_ref.shape
    dh = D // head

    x = o_ref[...]                           # (Bt, N, D)
    n1w, n1b = n1w_ref[0], n1b_ref[0]        # (1, D)
    n2w, n2b = n2w_ref[0], n2b_ref[0]

    # ---- token mixing: x + MultiHeadMlp over the token axis ----------------
    # dot_general contracts over tokens directly -> no (N, D) transposes and
    # no (D, N) concatenate; everything stays in (N, .) row layout.
    rows = []
    for b in range(Bt):                      # static unroll (Bt is small)
        xb = x[b]                            # (N, D)
        xn = _layernorm(xb, n1w, n1b)
        parts = []
        for h in range(head):                # static unroll (head == 4)
            sl = slice(h * dh, (h + 1) * dh)
            xh = xn[:, sl]                   # (N, dh)
            # u[c, j] = sum_n xh[n, c] * W1[n, j]          -> (dh, hid)
            u = lax.dot_general(
                xh, tfc1_ref[0, h],
                (((0,), (0,)), ((), ())),
                preferred_element_type=jnp.float32,
            )
            u = _gelu(u + tb1_ref[0, h])     # bias (1, hid)
            # t[n, c] = sum_j W2[j, n] * u[c, j]           -> (N, dh)
            th = lax.dot_general(
                tfc2_ref[0, h], u,
                (((0,), (1,)), ((), ())),
                preferred_element_type=jnp.float32,
            )
            parts.append(xb[:, sl] + th + tb2_ref[0, h])   # bias (N, 1)
        rows.append(jnp.concatenate(parts, axis=1))        # (N, D)
    x2 = jnp.concatenate(rows, axis=0) if Bt > 1 else rows[0]   # (Bt*N, D)

    # ---- channel mixing: one big (Bt*N, D) x (D, Ch) matmul ----------------
    xn2 = _layernorm(x2, n2w, n2b)
    hcm = _gelu(
        jnp.dot(xn2, cfc1_ref[0], preferred_element_type=jnp.float32)
        + cb1_ref[0]
    )
    x2 = (
        x2
        + jnp.dot(hcm, cfc2_ref[0], preferred_element_type=jnp.float32)
        + cb2_ref[0]
    )

    o_ref[...] = x2.reshape(Bt, N, D)


def head_kernel(x_ref, nw_ref, nb_ref, hw_ref, hb_ref, o_ref):
    x = x_ref[...]                                         # (Bh, N, D)
    xn = _layernorm(x, nw_ref[...], nb_ref[...])
    pooled = jnp.mean(xn, axis=1)                          # (Bh, D)
    o_ref[...] = (
        jnp.dot(pooled, hw_ref[...], preferred_element_type=jnp.float32)
        + hb_ref[...]
    )


# ---------------------------------------------------------------- wrappers --

def extract_patches(x, p):
    # NCHW -> (B, N, C*p*p); flatten order (C, ph, pw) matches Conv2d weights
    B, C, H, W = x.shape
    gh, gw = H // p, W // p
    x = x.reshape(B, C, gh, p, gw, p)
    x = x.transpose(0, 2, 4, 1, 3, 5)                      # (B, gh, gw, C, p, p)
    return x.reshape(B, gh * gw, C * p * p)


def stem_call(patches2d, w, b):
    M, K = patches2d.shape
    D = w.shape[1]
    rt = M if M <= 1024 else 512                           # rows per grid step
    return pl.pallas_call(
        stem_kernel,
        out_shape=jax.ShapeDtypeStruct((M, D), jnp.float32),
        grid=(pl.cdiv(M, rt),),
        in_specs=[
            pl.BlockSpec((rt, K), lambda i: (i, 0)),
            pl.BlockSpec((K, D), lambda i: (0, 0)),
            pl.BlockSpec((1, D), lambda i: (0, 0)),
        ],
        out_specs=pl.BlockSpec((rt, D), lambda i: (i, 0)),
        compiler_params=pltpu.CompilerParams(dimension_semantics=("parallel",)),
    )(patches2d, w, b)


def _choose_bt(B, N):
    # prefer >= 2 independent batch steps (dual-TC chips), but grow the tile
    # so the channel-MLP matmul sees a few hundred rows per step when B allows
    if B <= 1:
        return 1
    bt = max(1, min(B // 2, -(-256 // N)))
    while B % bt:
        bt -= 1
    return bt


def mixer_blocks_call(x, params, *, head, bt):
    B, N, D = x.shape
    L = params["n1w"].shape[0]
    names = ("n1w", "n1b", "tfc1", "tb1", "tfc2", "tb2",
             "n2w", "n2b", "cfc1", "cb1", "cfc2", "cb2")
    plist = [params[k] for k in names]

    def layer_spec(a):
        zeros = (0,) * (a.ndim - 1)
        return pl.BlockSpec((1,) + tuple(a.shape[1:]),
                            lambda b, l, _z=zeros: (l,) + _z)

    in_specs = [pl.BlockSpec((bt, N, D), lambda b, l: (b, 0, 0))]
    in_specs += [layer_spec(a) for a in plist]

    cp = dict(dimension_semantics=("parallel", "arbitrary"))
    vl = _vmem_limit_bytes()
    if vl is not None:
        cp["vmem_limit_bytes"] = vl

    return pl.pallas_call(
        functools.partial(mixer_blocks_kernel, head=head),
        out_shape=jax.ShapeDtypeStruct((B, N, D), jnp.float32),
        grid=(B // bt, L),
        in_specs=in_specs,
        out_specs=pl.BlockSpec((bt, N, D), lambda b, l: (b, 0, 0)),
        compiler_params=pltpu.CompilerParams(**cp),
    )(x, *plist)


def head_call(x, nw, nb, hw, hb):
    B, N, D = x.shape
    nc = hw.shape[1]
    cpad = -(-nc // 128) * 128                             # lane-dense output
    if cpad != nc:
        hw = jnp.pad(hw, ((0, 0), (0, cpad - nc)))
        hb = jnp.pad(hb, ((0, 0), (0, cpad - nc)))
    bh = B if B < 64 else 64
    out = pl.pallas_call(
        head_kernel,
        out_shape=jax.ShapeDtypeStruct((B, cpad), jnp.float32),
        grid=(pl.cdiv(B, bh),),
        in_specs=[
            pl.BlockSpec((bh, N, D), lambda i: (i, 0, 0)),
            pl.BlockSpec((1, D), lambda i: (0, 0)),
            pl.BlockSpec((1, D), lambda i: (0, 0)),
            pl.BlockSpec((D, cpad), lambda i: (0, 0)),
            pl.BlockSpec((1, cpad), lambda i: (0, 0)),
        ],
        out_specs=pl.BlockSpec((bh, cpad), lambda i: (i, 0)),
        compiler_params=pltpu.CompilerParams(dimension_semantics=("parallel",)),
    )(x, nw, nb, hw, hb)
    return out[:, :nc]


def mlp_mixer_forward(x, params, *, patch_size, head):
    B = x.shape[0]
    patches = extract_patches(x, patch_size)               # (B, N, C*p*p)
    N = patches.shape[1]
    D = params["stem_w"].shape[1]
    emb = stem_call(patches.reshape(B * N, -1), params["stem_w"], params["stem_b"])
    xt = emb.reshape(B, N, D)
    xt = mixer_blocks_call(xt, params, head=head, bt=_choose_bt(B, N))
    return head_call(
        xt, params["norm_w"], params["norm_b"], params["head_w"], params["head_b"]
    )


# ------------------------------------------------------------- parameters ---

def init_params(key, *, in_chans, patch_size, hidden_dim, num_patches,
                num_blocks, mlp_ratio, num_classes, head):
    D, N, L = hidden_dim, num_patches, num_blocks
    tokens_dim = int(mlp_ratio[0] * D)
    channels_dim = int(mlp_ratio[1] * D)
    hid_tok = tokens_dim // head
    K = in_chans * patch_size * patch_size

    def xavier_uniform(k, shape, fan_in, fan_out):
        bound = math.sqrt(6.0 / (fan_in + fan_out))
        return jax.random.uniform(k, shape, jnp.float32, -bound, bound)

    ks = jax.random.split(key, 7)
    params = {
        # stem conv (lecun-normal-ish, fan_in = C*p*p), zero bias
        "stem_w": jax.random.normal(ks[0], (K, D), jnp.float32) * math.sqrt(1.0 / K),
        "stem_b": jnp.zeros((1, D), jnp.float32),
        # per-block params stacked on a leading (num_blocks, ...) axis
        "n1w": jnp.ones((L, 1, D), jnp.float32),
        "n1b": jnp.zeros((L, 1, D), jnp.float32),
        "tfc1": xavier_uniform(ks[1], (L, head, N, hid_tok),
                               N * hid_tok, head * hid_tok),
        "tb1": jnp.zeros((L, head, 1, hid_tok), jnp.float32),
        "tfc2": xavier_uniform(ks[2], (L, head, hid_tok, N),
                               hid_tok * N, head * N),
        "tb2": jnp.zeros((L, head, N, 1), jnp.float32),    # token-major layout
        "n2w": jnp.ones((L, 1, D), jnp.float32),
        "n2b": jnp.zeros((L, 1, D), jnp.float32),
        "cfc1": xavier_uniform(ks[3], (L, D, channels_dim), D, channels_dim),
        "cb1": jax.random.normal(ks[4], (L, 1, channels_dim), jnp.float32) * 1e-6,
        "cfc2": xavier_uniform(ks[5], (L, channels_dim, D), channels_dim, D),
        "cb2": jax.random.normal(ks[6], (L, 1, D), jnp.float32) * 1e-6,
        # final norm + head (head weight zeros per reference _init_weights)
        "norm_w": jnp.ones((1, D), jnp.float32),
        "norm_b": jnp.zeros((1, D), jnp.float32),
        "head_w": jnp.zeros((D, num_classes), jnp.float32),
        "head_b": jnp.zeros((1, num_classes), jnp.float32),
    }
    return params


# --------------------------------------------------- plain-JAX reference ----

def _reference_blocks(xt, params, head):
    # torch-style formulation (transpose + per-head batched matmul) used only
    # to validate the fused Pallas mixer-block kernel.
    L = params["n1w"].shape[0]
    B, N, D = xt.shape
    dh = D // head
    x = xt
    for l in range(L):
        xn = _layernorm(x, params["n1w"][l], params["n1b"][l])
        y = jnp.transpose(xn, (0, 2, 1)).reshape(B, head, dh, N)
        t = jnp.einsum("bhcn,hnj->bhcj", y, params["tfc1"][l],
                       precision="highest") + params["tb1"][l]
        t = _gelu(t)
        t = jnp.einsum("bhcj,hjn->bhcn", t, params["tfc2"][l],
                       precision="highest") + jnp.transpose(params["tb2"][l], (0, 2, 1))
        x = x + t.reshape(B, D, N).transpose(0, 2, 1)
        xn2 = _layernorm(x, params["n2w"][l], params["n2b"][l])
        hcm = _gelu(jnp.einsum("bnd,dc->bnc", xn2, params["cfc1"][l],
                               precision="highest") + params["cb1"][l])
        x = x + jnp.einsum("bnc,cd->bnd", hcm, params["cfc2"][l],
                           precision="highest") + params["cb2"][l]
    return x


# ------------------------------------------------------------------- main ---

if __name__ == "__main__":
    # small config consistent with MlpMixer(__init__) shape logic
    B, in_chans, img_size, patch_size = 2, 3, 16, 4
    hidden_dim, num_blocks, num_classes = 32, 2, 10
    mlp_ratio = (0.5, 4.0)
    head = 4                                       # MixerBlock -> MutiHeadMlp(head=4)
    num_patches = (img_size // patch_size) ** 2    # 16

    key = jax.random.PRNGKey(0)
    k_in, k_params = jax.random.split(key)
    x = jax.random.normal(k_in, (B, in_chans, img_size, img_size), jnp.float32)

    params = init_params(
        k_params,
        in_chans=in_chans, patch_size=patch_size, hidden_dim=hidden_dim,
        num_patches=num_patches, num_blocks=num_blocks, mlp_ratio=mlp_ratio,
        num_classes=num_classes, head=head,
    )

    # full forward pass
    out = mlp_mixer_forward(x, params, patch_size=patch_size, head=head)
    out = jax.block_until_ready(out)
    assert out.shape == (B, num_classes)
    assert bool(jnp.all(jnp.isfinite(out)))

    # validate the fused mixer-block kernel against a plain-JAX reference
    # (the classifier weights are zero per the reference init, so the final
    #  logits alone would be a weak check)
    patches = extract_patches(x, patch_size).reshape(B * num_patches, -1)
    xt0 = stem_call(patches, params["stem_w"], params["stem_b"])
    xt0 = xt0.reshape(B, num_patches, hidden_dim)
    mixed = mixer_blocks_call(xt0, params, head=head,
                              bt=_choose_bt(B, num_patches))
    ref = _reference_blocks(xt0, params, head)
    assert bool(jnp.allclose(mixed, ref, atol=2e-3, rtol=2e-3)), \
        "fused mixer kernel deviates from reference"

    print("KERNEL_OK")
</pallas_src>

<mosaic_0001>
module attributes {stable_mosaic.version = 11 : i64} {
  func.func @stem_kernel(%arg0: i32, %arg1: memref<32x48xf32, #tpu.memory_space<vmem>>, %arg2: memref<48x32xf32, #tpu.memory_space<vmem>>, %arg3: memref<1x32xf32, #tpu.memory_space<vmem>>, %arg4: memref<32x32xf32, #tpu.memory_space<vmem>>) attributes {dimension_semantics = [#tpu.dimension_semantics<parallel>], iteration_bounds = array<i64: 1>, scalar_prefetch = 0 : i64, scratch_operands = 0 : i64, tpu.core_type = #tpu.core_type<tc>, window_params = [{transform_indices = @transform_0, window_bounds = array<i64: 32, 48>}, {pipeline_mode = #tpu.pipeline_mode<synchronous>, transform_indices = @transform_1, window_bounds = array<i64: 48, 32>}, {pipeline_mode = #tpu.pipeline_mode<synchronous>, transform_indices = @transform_2, window_bounds = array<i64: 1, 32>}, {transform_indices = @transform_3, window_bounds = array<i64: 32, 32>}]} {
    %c0 = arith.constant 0 : index
    %c0_0 = arith.constant 0 : index
    %0 = vector.load %arg1[%c0, %c0_0] : memref<32x48xf32, #tpu.memory_space<vmem>>, vector<32x48xf32>
    %c0_1 = arith.constant 0 : index
    %c0_2 = arith.constant 0 : index
    %1 = vector.load %arg2[%c0_1, %c0_2] : memref<48x32xf32, #tpu.memory_space<vmem>>, vector<48x32xf32>
    %cst = arith.constant dense<0.000000e+00> : vector<32x32xf32>
    %2 = tpu.matmul %0, %1, %cst {dimension_numbers = #tpu.dot_dimension_numbers<[1], [0], [0], [1], [0, 0, 1, 1], [], []>} : vector<32x48xf32>, vector<48x32xf32>, vector<32x32xf32> -> vector<32x32xf32>
    %c0_3 = arith.constant 0 : index
    %c0_4 = arith.constant 0 : index
    %3 = vector.load %arg3[%c0_3, %c0_4] : memref<1x32xf32, #tpu.memory_space<vmem>>, vector<1x32xf32>
    %4 = vector.broadcast %3 : vector<1x32xf32> to vector<32x32xf32>
    %5 = arith.addf %2, %4 : vector<32x32xf32>
    %c0_5 = arith.constant 0 : index
    %c0_6 = arith.constant 0 : index
    %6 = vector.load %arg4[%c0_5, %c0_6] : memref<32x32xf32, #tpu.memory_space<vmem>>, vector<32x32xf32>
    tpu.vector_store %arg4[%c0_5, %c0_6], %5 {strides = array<i32>} : memref<32x32xf32, #tpu.memory_space<vmem>>, vector<32x32xf32>,
    return
  }
  func.func @transform_0(%arg0: i32) -> (i32, i32) {
    %c0_i32 = arith.constant 0 : i32
    %c0_i32_0 = arith.constant 0 : i32
    return %arg0, %c0_i32 : i32, i32
  }
  func.func @transform_1(%arg0: i32) -> (i32, i32) {
    %c0_i32 = arith.constant 0 : i32
    %c0_i32_0 = arith.constant 0 : i32
    %c0_i32_1 = arith.constant 0 : i32
    return %c0_i32, %c0_i32_0 : i32, i32
  }
  func.func @transform_2(%arg0: i32) -> (i32, i32) {
    %c0_i32 = arith.constant 0 : i32
    %c0_i32_0 = arith.constant 0 : i32
    %c0_i32_1 = arith.constant 0 : i32
    return %c0_i32, %c0_i32_0 : i32, i32
  }
  func.func @transform_3(%arg0: i32) -> (i32, i32) {
    %c0_i32 = arith.constant 0 : i32
    %c0_i32_0 = arith.constant 0 : i32
    return %arg0, %c0_i32 : i32, i32
  }
}

</mosaic_0001>

<bundles_post_ra>
// kernel: tpu_custom_call.1
= control target key start
LH: loop header
LB: loop body
LE: loop exit
PB: predicated region body
PF: predicated region fallthrough
CT: control target
= control target key end

     0   :  { %s280_s0 = inlined_call_operand.vmem [shape: f32[32,48], index: 0, kind: input, shape index: {}]   ;;  %s281_s1 = inlined_call_operand.vmem [shape: f32[48,32], index: 1, kind: input, shape index: {}]   ;;  %s282_s2 = inlined_call_operand.vmem [shape: f32[1,32], index: 2, kind: input, shape index: {}]   ;;  %s283_s3 = inlined_call_operand.hbm [shape: f32[32,32], index: 3, kind: output, shape index: {}]  }
   0x1   :  { %v24_v0 = vld [vmem:[%s281_s1 + $0x28] sm:$0xff]  ;;  %v23_v1 = vld [vmem:[%s281_s1 + $0x20] sm:$0xff]  ;;  %v22_v2 = vld [vmem:[%s281_s1 + $0x18] sm:$0xff] }
   0x2   :  { %166 = vmatprep.subr.mxu0 %v24_v0  ;;  %184 = vmatprep.subr.mxu1 %v24_v0 }
   0x3   :  { %167 = vmatpush3.msra.mxu0 %v24_v0  ;;  %190 = vmatpush3.msra.mxu1 %v24_v0 }
   0x4   :  { %168 = vmatprep.subr.mxu0 %v23_v1  ;;  %185 = vmatprep.subr.mxu1 %v23_v1 }
   0x5   :  { %8 = vsyncpa [#allocation3], 0  ;;  %169 = vmatpush3.msra.mxu0 %v23_v1  ;;  %191 = vmatpush3.msra.mxu1 %v23_v1  ;;  %v21_v3 = vld [vmem:[%s281_s1 + $0x10] sm:$0xff]  ;;  %v20_v4 = vld [vmem:[%s281_s1 + $0x8] sm:$0xff]  ;;  %vm32_vm0 = vcmask 392192   ;;  %s221_s6 = smov [#allocation2]  }
   0x6   :  { %170 = vmatprep.subr.mxu0 %v22_v2  ;;  %186 = vmatprep.subr.mxu1 %v22_v2  ;;  %v19_v5 = vld [vmem:[%s281_s1] sm:$0xff]  ;;  %v17_v7 = vld [vmem:[%s280_s0 + $0x10] sm:$0xff]  ;;  %v16_v8 = vld [vmem:[%s280_s0 + $0x8] sm:$0xff]  ;;  %s140_s7 = sshll.u32 %s221_s6, 4  ;;  %vm130_vm1 = vcmask 261120   ;;  %s141_s7 = int_to_ptr.vmem [resolvable:$true] %s140_s7 }
   0x7   :  { %171 = vmatpush3.msra.mxu0 %v22_v2  ;;  %192 = vmatpush3.msra.mxu1 %v22_v2  ;;  %v15_v6 = vld [vmem:[%s280_s0] sm:$0xff]  ;;  %v18_v9 = vld [vmem:[%s280_s0 + $0x18] sm:$0xff]  ;;  %s199_s0 = scalar_lea.vmem %s141_s7, 512  ;;  %p204_p1 = scmp.lt.s32.totalorder %s141_s7, %s141_s7 }
   0x8   :  { %172 = vmatprep.subr.mxu0 %v21_v3  ;;  %187 = vmatprep.subr.mxu1 %v21_v3  ;;  %v151_v10 = vld [vmem:[%s282_s2] ss:$0 sm:$0xff]  ;;  %p200_p0 = scmp.ne.s32.totalorder %s141_s7, %s199_s0  ;;  %p205_p2 = scmp.lt.s32.totalorder %s199_s0, %s199_s0 }
   0x9   :  { %173 = vmatpush3.msra.mxu0 %v21_v3  ;;  %193 = vmatpush3.msra.mxu1 %v21_v3 }
   0xa   :  { %174 = vmatprep.subr.mxu0 %v20_v4  ;;  %188 = vmatprep.subr.mxu1 %v20_v4  ;;  %p206_p3 = por %p205_p2, %p204_p1 }
   0xb   :  { %175 = vmatpush3.msra.mxu0 %v20_v4  ;;  %194 = vmatpush3.msra.mxu1 %v20_v4 }
   0xc   :  { %176 = vmatprep.subr.mxu0 %v19_v5  ;;  %189 = vmatprep.subr.mxu1 %v19_v5  ;;  %p207_p4 = pnand %p206_p3, %p200_p0 }
   0xd   :  { %177 = vmatpush3.msra.mxu0 %v19_v5  ;;  %195 = vmatpush3.msra.mxu1 %v19_v5 }
   0xe   :  { %178 = vmatprep.mubr.msk.f32.mxu0 %vm32_vm0, %v15_v6  ;;  %181 = vmatprep.mubr.msk.f32.mxu1 %vm32_vm0, %v17_v7 }
   0xf   :  { %179 = vmatmul.mubr.msk.f32.vlgmr.msra.gmra.mxu0 %vm32_vm0, %v16_v8  ;;  %182 = vmatmul.mubr.msk.f32.vlgmr.msra.gmra.mxu1 %vm32_vm0, %v18_v9 }
  0xcf   :  { %v180_v11 = vpop.f32.mrf.mxu0  ;;  %v183_v12 = vpop.f32.mrf.mxu1 }
  0xd0   :  { %v117_v13 = vadd.f32 %v180_v11, %v151_v10  ;;  %v127_v14 = vadd.f32 %v183_v12, %v151_v10 }
  0xd1   :  { %v111_v15 = vpop.f32.mrf.mxu0  ;;  %v121_v16 = vpop.f32.mrf.mxu1 }
  0xd2   :  { %132 = vst.msk [vmem:[#allocation2 + $0x8] sm:$0xff] %vm130_vm1, %v117_v13  ;;  %134 = vst.msk [vmem:[#allocation2 + $0x18] sm:$0xff] %vm130_vm1, %v127_v14  ;;  %v112_v17 = vadd.f32 %v151_v10, %v111_v15  ;;  %v122_v18 = vadd.f32 %v151_v10, %v121_v16 }
  0xd4   :  { %131 = vst.msk [vmem:[#allocation2] sm:$0xff] %vm130_vm1, %v112_v17  ;;  %133 = vst.msk [vmem:[#allocation2 + $0x10] sm:$0xff] %vm130_vm1, %v122_v18 }
  0xd5   :  { %210 = shalt.err (!%p207_p4)
}
  0xd6   :  { %s222_s2 = smov 128   ;;  %s223_s8 = smov 8  }
  0xd7   :  { %146 = dma.vmem_to_hbm [thread:$0]  %s141_s7, 512, %s283_s3, [#allocation3], %s222_s2, %s222_s2, %s223_s8  }
  0xd8   :  { %219 = dma.done.wait [#allocation3], 512  }
  0xd9   :  { %220 = vsyncadd [#allocation3], 4294966784 }
  0xda   :  { %150 = vsyncpa [#allocation3], 1 }

</bundles_post_ra>
